<compile_context>
chip_gen: v5e
topology: v5e:2x2
jax: 0.10.0
libtpu: 0.0.40
codegen_flags: <defaults>
</compile_context>

<pallas_src>
import functools

import jax
import jax.numpy as jnp
from jax.experimental import pallas as pl
from jax.experimental.pallas import tpu as pltpu

AUDIO_EXP_LIST = (0, 1, 2, 3, 4, 5, 7, 10, 13)
EXP_DIM = 64
SUBLANES = 8


def _exp3dmm_loss_kernel(a_ref, e_ref, g_ref, out_ref, acc_ref, *,
                         w_exp, inv_n_mouth, tiles_per_split, total_rows,
                         needs_mask):
    i = pl.program_id(1)  # reduction axis (innermost, "arbitrary")

    @pl.when(i == 0)
    def _():
        acc_ref[...] = jnp.zeros_like(acc_ref)

    tr, lanes = a_ref.shape

    # Upcast inside the kernel (inputs may be bf16); upcast-before-subtract to
    # match the reference numerics.
    a = a_ref[...].astype(jnp.float32)   # (tr, lanes)
    e = e_ref[...].astype(jnp.float32)
    g = g_ref[...].astype(jnp.float32)

    # Mouth-coefficient weight row built in-kernel from a lane iota
    # (coefficient index == lane % 64); folds 1/n_mouth. No extra input stream.
    lane = jax.lax.broadcasted_iota(jnp.int32, (1, lanes), 1) % EXP_DIM
    wm = jnp.zeros((1, lanes), jnp.float32)
    for idx in AUDIO_EXP_LIST:
        wm = wm + jnp.where(lane == idx, jnp.float32(inv_n_mouth), 0.0)

    # Fused, pre-weighted contribution; pure VPU work per step.
    contrib = jnp.abs(g - a) * wm + jnp.abs(e - g) * w_exp

    if needs_mask:
        # Mask rows beyond the logical extent (ragged last tile / duplicated
        # clamp tiles). Must be a where-select, not multiply: OOB block data
        # is unspecified and could be NaN/Inf.
        tile = pl.program_id(0) * tiles_per_split + i
        row = tile * tr + jax.lax.broadcasted_iota(jnp.int32, (tr, lanes), 0)
        contrib = jnp.where(row < total_rows, contrib, 0.0)

    # Fold sublane groups into the small (8, lanes) accumulator
    # (tr/8 - 1 extra vreg adds; no XLU, minimal accumulator VMEM traffic).
    acc_ref[...] += contrib.reshape(tr // SUBLANES, SUBLANES, lanes).sum(axis=0)

    @pl.when(i == pl.num_programs(1) - 1)
    def _():
        out_ref[...] = acc_ref[...]


def _num_tensorcores():
    """Best-effort: 2 TensorCores on v7x, 1 on earlier generations."""
    try:
        kind = jax.devices()[0].device_kind.lower()
    except Exception:  # pragma: no cover - defensive default
        return 1
    return 2 if "v7" in kind else 1


def exp3dmm_loss(audio_exp, exp, video, gt_3dmm, *, exp_weight,
                 tile_rows=2048, num_splits=None):
    """Pallas implementation of Exp3DMMLoss.forward.

    audio_exp, exp, gt_3dmm: (B, win, 64) arrays (any float dtype).
    video: (B, 3, H, W) -- unused by the loss (kept for signature parity).
    Returns a scalar float32 loss.
    """
    del video  # does not contribute to the loss in the reference forward
    B, W, D = exp.shape
    assert D == EXP_DIM
    assert audio_exp.shape == exp.shape == gt_3dmm.shape
    n_elems = B * W * D

    # Lane-dense view: free reshape, no pad, no copy. 128 lanes whenever the
    # element count allows (coefficient index == lane % 64 since 128 % 64 == 0),
    # otherwise 64 (== full coefficient dim, allowed as a full-extent block dim).
    lanes = 128 if n_elems % 128 == 0 else EXP_DIM
    rows = n_elems // lanes

    # Tile rows: multiple of 8, never more than needed (small-input fast path:
    # tiny shapes collapse to a single (1, 1) grid step).
    rows_rounded = pl.cdiv(rows, SUBLANES) * SUBLANES
    tr = max(SUBLANES, (min(int(tile_rows), rows_rounded) // SUBLANES) * SUBLANES)
    total_tiles = pl.cdiv(rows, tr)

    # Megacore split: only on 2-TC chips (v7x) and only when each core gets a
    # meaningful amount of streamed bytes (>= ~1 MiB across the 3 inputs).
    if num_splits is None:
        num_splits = _num_tensorcores()
    num_splits = max(1, min(int(num_splits), total_tiles))
    itemsize = jnp.dtype(exp.dtype).itemsize
    if num_splits > 1 and (3 * rows * lanes * itemsize) // num_splits < (1 << 20):
        num_splits = 1
    tiles_per_split = pl.cdiv(total_tiles, num_splits)

    needs_clamp = num_splits * tiles_per_split != total_tiles
    needs_mask = needs_clamp or (rows % tr != 0)

    a2 = audio_exp.reshape(rows, lanes)
    e2 = exp.reshape(rows, lanes)
    g2 = gt_3dmm.reshape(rows, lanes)

    inv_n_mouth = 1.0 / float(B * W * len(AUDIO_EXP_LIST))
    w_exp = float(exp_weight) / float(n_elems)

    kernel = functools.partial(
        _exp3dmm_loss_kernel, w_exp=w_exp, inv_n_mouth=inv_n_mouth,
        tiles_per_split=tiles_per_split, total_rows=rows, needs_mask=needs_mask)

    last_tile = total_tiles - 1
    if needs_clamp:
        def row_map(c, i):
            # Clamp so the block start stays in-bounds; the duplicated tile's
            # contribution is zeroed by the in-kernel row mask.
            return (jnp.minimum(c * tiles_per_split + i, last_tile), 0)
    else:
        def row_map(c, i):
            return (c * tiles_per_split + i, 0)

    row_spec = pl.BlockSpec((tr, lanes), row_map)
    out_spec = pl.BlockSpec((SUBLANES, lanes), lambda c, i: (c, 0))

    partials = pl.pallas_call(
        kernel,
        grid=(num_splits, tiles_per_split),
        in_specs=[row_spec, row_spec, row_spec],
        out_specs=out_spec,
        out_shape=jax.ShapeDtypeStruct((num_splits * SUBLANES, lanes),
                                       jnp.float32),
        scratch_shapes=[pltpu.VMEM((SUBLANES, lanes), jnp.float32)],
        compiler_params=pltpu.CompilerParams(
            # leading split axis parallel (v7x megacore), reduction arbitrary
            dimension_semantics=("parallel", "arbitrary")),
    )(a2, e2, g2)

    # Tiny final combine of per-split (8, lanes) partial-sum blocks.
    return jnp.sum(partials)


def _reference_loss(audio_exp, exp, gt_3dmm, exp_weight):
    idx = jnp.array(AUDIO_EXP_LIST)
    mouth = jnp.mean(jnp.abs(gt_3dmm[..., idx] - audio_exp[..., idx]))
    tdmm = jnp.mean(jnp.abs(exp - gt_3dmm)) * exp_weight
    return mouth + tdmm


if __name__ == "__main__":
    key = jax.random.PRNGKey(0)
    k1, k2, k3, k4 = jax.random.split(key, 4)

    B, WIN, D = 2, 8, EXP_DIM
    H = Wd = 16
    exp_weight = 1.5  # deterministic synthetic config['exp_weight']

    audio_exp = jax.random.normal(k1, (B, WIN, D), jnp.float32)
    exp = jax.random.normal(k2, (B, WIN, D), jnp.float32)
    gt_3dmm = jax.random.normal(k3, (B, WIN, D), jnp.float32)
    video = jax.random.normal(k4, (B, 3, H, Wd), jnp.float32)  # unused by loss

    loss = exp3dmm_loss(audio_exp, exp, video, gt_3dmm, exp_weight=exp_weight)
    loss = jax.block_until_ready(loss)

    ref = _reference_loss(audio_exp, exp, gt_3dmm, exp_weight)
    assert jnp.allclose(loss, ref, rtol=1e-5, atol=1e-5), (loss, ref)

    # Exercise the ragged-tail / masking path too (odd B*win -> 64 lanes,
    # rows not a multiple of the tile), still no wrapper-side padding copy.
    B2, WIN2 = 3, 7
    a2 = jax.random.normal(k1, (B2, WIN2, D), jnp.float32)
    e2 = jax.random.normal(k2, (B2, WIN2, D), jnp.float32)
    g2 = jax.random.normal(k3, (B2, WIN2, D), jnp.float32)
    loss2 = jax.block_until_ready(
        exp3dmm_loss(a2, e2, None, g2, exp_weight=exp_weight, tile_rows=16))
    ref2 = _reference_loss(a2, e2, g2, exp_weight)
    assert jnp.allclose(loss2, ref2, rtol=1e-5, atol=1e-5), (loss2, ref2)

    print("KERNEL_OK")
</pallas_src>

<mosaic_0001>
module attributes {stable_mosaic.version = 11 : i64} {
  func.func @_exp3dmm_loss_kernel(%arg0: i32, %arg1: i32, %arg2: memref<8x128xf32, #tpu.memory_space<vmem>>, %arg3: memref<8x128xf32, #tpu.memory_space<vmem>>, %arg4: memref<8x128xf32, #tpu.memory_space<vmem>>, %arg5: memref<8x128xf32, #tpu.memory_space<vmem>>, %arg6: memref<8x128xf32, #tpu.memory_space<vmem>>) attributes {dimension_semantics = [#tpu.dimension_semantics<parallel>, #tpu.dimension_semantics<arbitrary>], iteration_bounds = array<i64: 1, 1>, scalar_prefetch = 0 : i64, scratch_operands = 1 : i64, tpu.core_type = #tpu.core_type<tc>, window_params = [{transform_indices = @transform_0, window_bounds = array<i64: 8, 128>}, {transform_indices = @transform_1, window_bounds = array<i64: 8, 128>}, {transform_indices = @transform_2, window_bounds = array<i64: 8, 128>}, {transform_indices = @transform_3, window_bounds = array<i64: 8, 128>}]} {
    %c0_i32 = arith.constant 0 : i32
    %0 = arith.cmpi eq, %arg1, %c0_i32 : i32
    %1 = arith.extui %0 : i1 to i32
    %c0_i32_0 = arith.constant 0 : i32
    %2 = arith.cmpi ne, %1, %c0_i32_0 : i32
    scf.if %2 {
      %cst_38 = arith.constant 0.000000e+00 : f32
      %95 = vector.broadcast %cst_38 : f32 to vector<8x128xf32>
      %c0_39 = arith.constant 0 : index
      %c0_40 = arith.constant 0 : index
      %96 = vector.load %arg6[%c0_39, %c0_40] : memref<8x128xf32, #tpu.memory_space<vmem>>, vector<8x128xf32>
      tpu.vector_store %arg6[%c0_39, %c0_40], %95 {strides = array<i32>} : memref<8x128xf32, #tpu.memory_space<vmem>>, vector<8x128xf32>,
    } else {
    }
    %c0 = arith.constant 0 : index
    %c0_1 = arith.constant 0 : index
    %3 = vector.load %arg2[%c0, %c0_1] : memref<8x128xf32, #tpu.memory_space<vmem>>, vector<8x128xf32>
    %c0_2 = arith.constant 0 : index
    %c0_3 = arith.constant 0 : index
    %4 = vector.load %arg3[%c0_2, %c0_3] : memref<8x128xf32, #tpu.memory_space<vmem>>, vector<8x128xf32>
    %c0_4 = arith.constant 0 : index
    %c0_5 = arith.constant 0 : index
    %5 = vector.load %arg4[%c0_4, %c0_5] : memref<8x128xf32, #tpu.memory_space<vmem>>, vector<8x128xf32>
    %6 = tpu.iota {dimensions = array<i32: 1>} : vector<1x128xi32>
    %c64_i32 = arith.constant 64 : i32
    %c0_i32_6 = arith.constant 0 : i32
    %7 = arith.cmpi eq, %c64_i32, %c0_i32_6 : i32
    %c1_i32 = arith.constant 1 : i32
    %8 = arith.select %7, %c1_i32, %c64_i32 : i32
    %9 = vector.broadcast %8 : i32 to vector<1x128xi32>
    %10 = arith.remsi %6, %9 : vector<1x128xi32>
    %c0_i32_7 = arith.constant 0 : i32
    %11 = vector.broadcast %c0_i32_7 : i32 to vector<1x128xi32>
    %12 = arith.cmpi ne, %10, %11 : vector<1x128xi32>
    %c0_i32_8 = arith.constant 0 : i32
    %13 = vector.broadcast %c0_i32_8 : i32 to vector<1x128xi32>
    %14 = arith.cmpi slt, %10, %13 : vector<1x128xi32>
    %c0_i32_9 = arith.constant 0 : i32
    %15 = arith.cmpi slt, %8, %c0_i32_9 : i32
    %16 = vector.broadcast %15 : i1 to vector<1x128xi1>
    %17 = vector.broadcast %16 : vector<1x128xi1> to vector<1x128xi1>
    %18 = arith.xori %14, %17 : vector<1x128xi1>
    %19 = arith.andi %18, %12 : vector<1x128xi1>
    %20 = vector.broadcast %8 : i32 to vector<1x128xi32>
    %21 = arith.addi %10, %20 : vector<1x128xi32>
    %22 = arith.select %19, %21, %10 : vector<1x128xi1>, vector<1x128xi32>
    %cst = arith.constant 0.000000e+00 : f32
    %23 = vector.broadcast %cst : f32 to vector<1x128xf32>
    %c0_i32_10 = arith.constant 0 : i32
    %24 = vector.broadcast %c0_i32_10 : i32 to vector<1x128xi32>
    %25 = arith.cmpi eq, %22, %24 : vector<1x128xi32>
    %cst_11 = arith.constant 0.0069444445 : f32
    %cst_12 = arith.constant 0.000000e+00 : f32
    %26 = vector.broadcast %cst_11 : f32 to vector<1x128xf32>
    %27 = vector.broadcast %cst_12 : f32 to vector<1x128xf32>
    %28 = arith.select %25, %26, %27 : vector<1x128xi1>, vector<1x128xf32>
    %29 = arith.addf %23, %28 : vector<1x128xf32>
    %c1_i32_13 = arith.constant 1 : i32
    %30 = vector.broadcast %c1_i32_13 : i32 to vector<1x128xi32>
    %31 = arith.cmpi eq, %22, %30 : vector<1x128xi32>
    %cst_14 = arith.constant 0.0069444445 : f32
    %cst_15 = arith.constant 0.000000e+00 : f32
    %32 = vector.broadcast %cst_14 : f32 to vector<1x128xf32>
    %33 = vector.broadcast %cst_15 : f32 to vector<1x128xf32>
    %34 = arith.select %31, %32, %33 : vector<1x128xi1>, vector<1x128xf32>
    %35 = arith.addf %29, %34 : vector<1x128xf32>
    %c2_i32 = arith.constant 2 : i32
    %36 = vector.broadcast %c2_i32 : i32 to vector<1x128xi32>
    %37 = arith.cmpi eq, %22, %36 : vector<1x128xi32>
    %cst_16 = arith.constant 0.0069444445 : f32
    %cst_17 = arith.constant 0.000000e+00 : f32
    %38 = vector.broadcast %cst_16 : f32 to vector<1x128xf32>
    %39 = vector.broadcast %cst_17 : f32 to vector<1x128xf32>
    %40 = arith.select %37, %38, %39 : vector<1x128xi1>, vector<1x128xf32>
    %41 = arith.addf %35, %40 : vector<1x128xf32>
    %c3_i32 = arith.constant 3 : i32
    %42 = vector.broadcast %c3_i32 : i32 to vector<1x128xi32>
    %43 = arith.cmpi eq, %22, %42 : vector<1x128xi32>
    %cst_18 = arith.constant 0.0069444445 : f32
    %cst_19 = arith.constant 0.000000e+00 : f32
    %44 = vector.broadcast %cst_18 : f32 to vector<1x128xf32>
    %45 = vector.broadcast %cst_19 : f32 to vector<1x128xf32>
    %46 = arith.select %43, %44, %45 : vector<1x128xi1>, vector<1x128xf32>
    %47 = arith.addf %41, %46 : vector<1x128xf32>
    %c4_i32 = arith.constant 4 : i32
    %48 = vector.broadcast %c4_i32 : i32 to vector<1x128xi32>
    %49 = arith.cmpi eq, %22, %48 : vector<1x128xi32>
    %cst_20 = arith.constant 0.0069444445 : f32
    %cst_21 = arith.constant 0.000000e+00 : f32
    %50 = vector.broadcast %cst_20 : f32 to vector<1x128xf32>
    %51 = vector.broadcast %cst_21 : f32 to vector<1x128xf32>
    %52 = arith.select %49, %50, %51 : vector<1x128xi1>, vector<1x128xf32>
    %53 = arith.addf %47, %52 : vector<1x128xf32>
    %c5_i32 = arith.constant 5 : i32
    %54 = vector.broadcast %c5_i32 : i32 to vector<1x128xi32>
    %55 = arith.cmpi eq, %22, %54 : vector<1x128xi32>
    %cst_22 = arith.constant 0.0069444445 : f32
    %cst_23 = arith.constant 0.000000e+00 : f32
    %56 = vector.broadcast %cst_22 : f32 to vector<1x128xf32>
    %57 = vector.broadcast %cst_23 : f32 to vector<1x128xf32>
    %58 = arith.select %55, %56, %57 : vector<1x128xi1>, vector<1x128xf32>
    %59 = arith.addf %53, %58 : vector<1x128xf32>
    %c7_i32 = arith.constant 7 : i32
    %60 = vector.broadcast %c7_i32 : i32 to vector<1x128xi32>
    %61 = arith.cmpi eq, %22, %60 : vector<1x128xi32>
    %cst_24 = arith.constant 0.0069444445 : f32
    %cst_25 = arith.constant 0.000000e+00 : f32
    %62 = vector.broadcast %cst_24 : f32 to vector<1x128xf32>
    %63 = vector.broadcast %cst_25 : f32 to vector<1x128xf32>
    %64 = arith.select %61, %62, %63 : vector<1x128xi1>, vector<1x128xf32>
    %65 = arith.addf %59, %64 : vector<1x128xf32>
    %c10_i32 = arith.constant 10 : i32
    %66 = vector.broadcast %c10_i32 : i32 to vector<1x128xi32>
    %67 = arith.cmpi eq, %22, %66 : vector<1x128xi32>
    %cst_26 = arith.constant 0.0069444445 : f32
    %cst_27 = arith.constant 0.000000e+00 : f32
    %68 = vector.broadcast %cst_26 : f32 to vector<1x128xf32>
    %69 = vector.broadcast %cst_27 : f32 to vector<1x128xf32>
    %70 = arith.select %67, %68, %69 : vector<1x128xi1>, vector<1x128xf32>
    %71 = arith.addf %65, %70 : vector<1x128xf32>
    %c13_i32 = arith.constant 13 : i32
    %72 = vector.broadcast %c13_i32 : i32 to vector<1x128xi32>
    %73 = arith.cmpi eq, %22, %72 : vector<1x128xi32>
    %cst_28 = arith.constant 0.0069444445 : f32
    %cst_29 = arith.constant 0.000000e+00 : f32
    %74 = vector.broadcast %cst_28 : f32 to vector<1x128xf32>
    %75 = vector.broadcast %cst_29 : f32 to vector<1x128xf32>
    %76 = arith.select %73, %74, %75 : vector<1x128xi1>, vector<1x128xf32>
    %77 = arith.addf %71, %76 : vector<1x128xf32>
    %78 = arith.subf %5, %3 : vector<8x128xf32>
    %79 = math.absf %78 : vector<8x128xf32>
    %80 = vector.broadcast %77 : vector<1x128xf32> to vector<8x128xf32>
    %81 = arith.mulf %79, %80 : vector<8x128xf32>
    %82 = arith.subf %4, %5 : vector<8x128xf32>
    %83 = math.absf %82 : vector<8x128xf32>
    %cst_30 = arith.constant 0.00146484375 : f32
    %84 = vector.broadcast %cst_30 : f32 to vector<8x128xf32>
    %85 = arith.mulf %83, %84 : vector<8x128xf32>
    %86 = arith.addf %81, %85 : vector<8x128xf32>
    %c0_31 = arith.constant 0 : index
    %c0_32 = arith.constant 0 : index
    %87 = vector.load %arg6[%c0_31, %c0_32] : memref<8x128xf32, #tpu.memory_space<vmem>>, vector<8x128xf32>
    %88 = vector.shape_cast %86 : vector<8x128xf32> to vector<1x8x128xf32>
    %cst_33 = arith.constant dense<0.000000e+00> : vector<8x128xf32>
    %89 = vector.multi_reduction <add>, %88, %cst_33 [0] : vector<1x8x128xf32> to vector<8x128xf32>
    %90 = arith.addf %87, %89 : vector<8x128xf32>
    %c0_34 = arith.constant 0 : index
    %c0_35 = arith.constant 0 : index
    %91 = vector.load %arg6[%c0_34, %c0_35] : memref<8x128xf32, #tpu.memory_space<vmem>>, vector<8x128xf32>
    tpu.vector_store %arg6[%c0_34, %c0_35], %90 {strides = array<i32>} : memref<8x128xf32, #tpu.memory_space<vmem>>, vector<8x128xf32>,
    %c0_i32_36 = arith.constant 0 : i32
    %92 = arith.cmpi eq, %arg1, %c0_i32_36 : i32
    %93 = arith.extui %92 : i1 to i32
    %c0_i32_37 = arith.constant 0 : i32
    %94 = arith.cmpi ne, %93, %c0_i32_37 : i32
    scf.if %94 {
      %c0_38 = arith.constant 0 : index
      %c0_39 = arith.constant 0 : index
      %95 = vector.load %arg6[%c0_38, %c0_39] : memref<8x128xf32, #tpu.memory_space<vmem>>, vector<8x128xf32>
      %c0_40 = arith.constant 0 : index
      %c0_41 = arith.constant 0 : index
      %96 = vector.load %arg5[%c0_40, %c0_41] : memref<8x128xf32, #tpu.memory_space<vmem>>, vector<8x128xf32>
      tpu.vector_store %arg5[%c0_40, %c0_41], %95 {strides = array<i32>} : memref<8x128xf32, #tpu.memory_space<vmem>>, vector<8x128xf32>,
    } else {
    }
    return
  }
  func.func @transform_0(%arg0: i32, %arg1: i32) -> (i32, i32) {
    %c1_i32 = arith.constant 1 : i32
    %0 = arith.muli %arg0, %c1_i32 : i32
    %1 = arith.addi %0, %arg1 : i32
    %c0_i32 = arith.constant 0 : i32
    %c0_i32_0 = arith.constant 0 : i32
    return %1, %c0_i32 : i32, i32
  }
  func.func @transform_1(%arg0: i32, %arg1: i32) -> (i32, i32) {
    %c1_i32 = arith.constant 1 : i32
    %0 = arith.muli %arg0, %c1_i32 : i32
    %1 = arith.addi %0, %arg1 : i32
    %c0_i32 = arith.constant 0 : i32
    %c0_i32_0 = arith.constant 0 : i32
    return %1, %c0_i32 : i32, i32
  }
  func.func @transform_2(%arg0: i32, %arg1: i32) -> (i32, i32) {
    %c1_i32 = arith.constant 1 : i32
    %0 = arith.muli %arg0, %c1_i32 : i32
    %1 = arith.addi %0, %arg1 : i32
    %c0_i32 = arith.constant 0 : i32
    %c0_i32_0 = arith.constant 0 : i32
    return %1, %c0_i32 : i32, i32
  }
  func.func @transform_3(%arg0: i32, %arg1: i32) -> (i32, i32) {
    %c0_i32 = arith.constant 0 : i32
    %c0_i32_0 = arith.constant 0 : i32
    return %arg0, %c0_i32 : i32, i32
  }
}

</mosaic_0001>

<bundles_post_ra>
// kernel: tpu_custom_call.1
= control target key start
LH: loop header
LB: loop body
LE: loop exit
PB: predicated region body
PF: predicated region fallthrough
CT: control target
= control target key end

     0   :  { %8 = vsyncpa [#allocation4], 0  ;;  %s295_s0 = inlined_call_operand.hbm [shape: f32[8,128], index: 0, kind: input, shape index: {}]   ;;  %s296_s1 = inlined_call_operand.hbm [shape: f32[8,128], index: 1, kind: input, shape index: {}]   ;;  %s297_s2 = inlined_call_operand.hbm [shape: f32[8,128], index: 2, kind: input, shape index: {}]   ;;  %s298_s3 = inlined_call_operand.hbm [shape: f32[8,128], index: 3, kind: output, shape index: {}]  }
   0x1   :  { %9 = vsyncpa [#allocation7], 0  ;;  %s33_s14 = sshll.u32 %s296_s1, 4  ;;  %s34_s14 = int_to_ptr.hbm [resolvable:$true] %s33_s14 }
   0x2   :  { %10 = vsyncpa [#allocation5], 0  ;;  %s258_s15 = smov [#allocation6]   ;;  %s19_s19 = sshll.u32 %s295_s0, 4  ;;  %s20_s19 = int_to_ptr.hbm [resolvable:$true] %s19_s19 }
   0x3   :  { %s35_s16 = sshll.u32 %s258_s15, 4  ;;  %s259_s20 = smov [#allocation3]   ;;  %s36_s16 = int_to_ptr.vmem [resolvable:$true] %s35_s16 }
   0x4   :  { %38 = dma.hbm_to_vmem [thread:$0]  %s34_s14, 128, %s36_s16, [#allocation7]  }
   0x5   :  { %s21_s21 = sshll.u32 %s259_s20, 4  ;;  %s47_s24 = sshll.u32 %s297_s2, 4  ;;  %s22_s21 = int_to_ptr.vmem [resolvable:$true] %s21_s21  ;;  %s48_s24 = int_to_ptr.hbm [resolvable:$true] %s47_s24 }
   0x6   :  { %24 = dma.hbm_to_vmem [thread:$0]  %s20_s19, 128, %s22_s21, [#allocation4]  }
   0x7   :  { %s260_s1 = smov [#allocation8]  }
   0x8   :  { %s49_s25 = sshll.u32 %s260_s1, 4  ;;  %s50_s25 = int_to_ptr.vmem [resolvable:$true] %s49_s25 }
   0x9   :  { %52 = dma.hbm_to_vmem [thread:$0]  %s48_s24, 128, %s50_s25, [#allocation7]  }
   0xa   :  { %252 = dma.done.wait [#allocation4], 128  }
   0xb   :  { %253 = vsyncadd [#allocation4], 4294967168 }
   0xc   :  { %254 = dma.done.wait [#allocation7], 256  }
   0xd   :  { %255 = vsyncadd [#allocation7], 4294967040  ;;  %v76_v0 = vlaneseq  ;;  %v261_v3 = vmov 0.0   ;;  %v74_v10 = vld [vmem:[#allocation6] sm:$0xff]  ;;  %v75_v11 = vld [vmem:[#allocation8] sm:$0xff]  ;;  %s262_s0 = smov [#allocation9]  }
   0xe   :  { %v73_v14 = vld [vmem:[#allocation3] sm:$0xff]  ;;  %v120_v17 = vsub.f32 %v74_v10, %v75_v11  ;;  %s138_s2 = sshll.u32 %s262_s0, 4  ;;  %s140_s28 = sshll.u32 %s298_s3, 4  ;;  %s139_s2 = int_to_ptr.vmem [resolvable:$true] %s138_s2  ;;  %s141_s28 = int_to_ptr.hbm [resolvable:$true] %s140_s28 }
   0xf   :  { %v77_v1 = vand.u32 127, %v76_v0  ;;  %v117_v20 = vsub.f32 %v75_v11, %v73_v14 }
  0x10   :  { %v121_v23 = vand.u32 2147483647, %v120_v17 }
  0x11   :  { %v82_v2 = vand.u32 63, %v77_v1  ;;  %v118_v26 = vand.u32 2147483647, %v117_v20 }
  0x12   :  { %v122_v28 = vmul.f32 0.0014648438, %v121_v23 }
  0x13   :  { %vm90_vm0 = vcmp.eq.s32.totalorder %v82_v2, 0  ;;  %vm93_vm1 = vcmp.eq.s32.totalorder %v82_v2, 1  ;;  %vm96_vm2 = vcmp.eq.s32.totalorder %v82_v2, 2  ;;  %vm99_vm3 = vcmp.eq.s32.totalorder %v82_v2, 3 }
  0x14   :  { %v91_v4 = vsel %vm90_vm0, 0.0069444445, %v261_v3  ;;  %v94_v5 = vsel %vm93_vm1, 0.0069444445, %v261_v3  ;;  %v97_v6 = vsel %vm96_vm2, 0.0069444445, %v261_v3 }
  0x15   :  { %v95_v7 = vadd.f32 %v94_v5, %v91_v4  ;;  %vm102_vm4 = vcmp.eq.s32.totalorder %v82_v2, 4  ;;  %v100_v8 = vsel %vm99_vm3, 0.0069444445, %v261_v3  ;;  %vm105_vm5 = vcmp.eq.s32.totalorder %v82_v2, 5 }
  0x16   :  { %v103_v12 = vsel %vm102_vm4, 0.0069444445, %v261_v3  ;;  %vm108_vm6 = vcmp.eq.s32.totalorder %v82_v2, 7  ;;  %v106_v15 = vsel %vm105_vm5, 0.0069444445, %v261_v3  ;;  %vm111_vm7 = vcmp.eq.s32.totalorder %v82_v2, 10 }
  0x17   :  { %v98_v9 = vadd.f32 %v97_v6, %v95_v7  ;;  %v109_v18 = vsel %vm108_vm6, 0.0069444445, %v261_v3  ;;  %vm114_vm8 = vcmp.eq.s32.totalorder %v82_v2, 13  ;;  %v112_v21 = vsel %vm111_vm7, 0.0069444445, %v261_v3 }
  0x18   :  { %v115_v24 = vsel %vm114_vm8, 0.0069444445, %v261_v3 }
  0x19   :  { %v101_v13 = vadd.f32 %v100_v8, %v98_v9 }
  0x1b   :  { %v104_v16 = vadd.f32 %v103_v12, %v101_v13 }
  0x1d   :  { %v107_v19 = vadd.f32 %v106_v15, %v104_v16 }
  0x1f   :  { %v110_v22 = vadd.f32 %v109_v18, %v107_v19 }
  0x21   :  { %v113_v25 = vadd.f32 %v112_v21, %v110_v22 }
  0x23   :  { %v116_v27 = vadd.f32 %v115_v24, %v113_v25 }
  0x25   :  { %v119_v29 = vmul.f32 %v118_v26, %v116_v27 }
  0x27   :  { %v123_v30 = vadd.f32 %v122_v28, %v119_v29 }
  0x29   :  { %132 = vst [vmem:[#allocation9] sm:$0xff] %v123_v30 }
  0x2a   :  { %143 = dma.vmem_to_hbm [thread:$0]  %s139_s2, 128, %s141_s28, [#allocation5]  }
  0x2b   :  { %256 = dma.done.wait [#allocation5], 128  }
  0x2c   :  { %257 = vsyncadd [#allocation5], 4294967168 }
  0x2d   :  { %148 = vsyncpa [#allocation4], 1 }
  0x2e   :  { %149 = vsyncpa [#allocation7], 1 }
  0x2f   :  { %150 = vsyncpa [#allocation5], 1 }

</bundles_post_ra>
